<compile_context>
chip_gen: v6e
topology: v6e:2x2x1
jax: 0.10.0
libtpu: 0.0.40
codegen_flags: <defaults>
</compile_context>

<pallas_src>
import functools
import math

import jax
import jax.numpy as jnp
from jax.experimental import pallas as pl
from jax.experimental.pallas import tpu as pltpu

LANE = 128
SUBLANE = 8


def _round_up(n, m):
    return ((n + m - 1) // m) * m


def policy_kernel(
    x_ref,                  # [TB, obs_n]            f32
    w1_ref, b1_ref,         # [obs_n, 256] bf16, [1, 256] f32        (affine1)
    wbr_ref, bbr_ref,       # [256, 256]  bf16, [1, 256] f32         (action1 || value1)
    whd_ref, bhd_ref,       # [256, OUT_PAD] bf16, [1, OUT_PAD] f32  (block-diag heads)
    out_ref,                # [TB, OUT_PAD] f32: cols 0:A = probs, col A = state value
    *,
    action_n,
):
    # affine1 + relu (obs_n -> 256).  bf16 x bf16 on the MXU, f32 accumulate;
    # bias-add / relu stay f32 (v5e VPU has no bf16 ALU), then narrow to bf16
    # only at the next MXU input.
    x = x_ref[...].astype(jnp.bfloat16)
    h = jnp.dot(x, w1_ref[...], preferred_element_type=jnp.float32) + b1_ref[...]
    h = jnp.maximum(h, 0.0).astype(jnp.bfloat16)

    # fused action1 || value1 (256 -> 256) + relu; lanes 0:128 = action branch,
    # lanes 128:256 = value branch.
    xav = jnp.dot(h, wbr_ref[...], preferred_element_type=jnp.float32) + bbr_ref[...]
    xav = jnp.maximum(xav, 0.0).astype(jnp.bfloat16)

    # fused block-diagonal heads (256 -> OUT_PAD):
    #   rows 0:128   x cols 0:A  = action_head
    #   rows 128:256 x col  A    = value_head
    z = jnp.dot(xav, whd_ref[...], preferred_element_type=jnp.float32) + bhd_ref[...]

    # masked softmax over the action columns only (value / padding lanes excluded).
    col = jax.lax.broadcasted_iota(jnp.int32, z.shape, 1)
    is_act = col < action_n
    zs = jnp.where(is_act, z, -jnp.inf)
    m = jnp.max(zs, axis=-1, keepdims=True)
    e = jnp.exp(zs - m)                      # exp(-inf) = 0 on masked lanes
    denom = jnp.sum(e, axis=-1, keepdims=True)
    probs = e / denom                        # exact normalization (sum == 1 to f32 eps)

    # single lane-dense store: probs | state_value | zeros
    out_ref[...] = jnp.where(is_act, probs, jnp.where(col == action_n, z, 0.0))


def pack_policy_params(params):
    """Fuse / pad the per-layer params into the kernel's packed layout."""
    A = params["wah"].shape[1]
    out_pad = _round_up(A + 1, LANE)

    # action1 || value1 column-concat  -> [256, 256]
    wbr = jnp.concatenate([params["wa1"], params["wv1"]], axis=1)
    bbr = jnp.concatenate([params["ba1"], params["bv1"]], axis=1)

    # block-diagonal heads -> [256, OUT_PAD]
    whd = jnp.zeros((256, out_pad), jnp.float32)
    whd = whd.at[:128, :A].set(params["wah"])
    whd = whd.at[128:, A].set(params["wvh"][:, 0])
    bhd = jnp.zeros((1, out_pad), jnp.float32)
    bhd = bhd.at[:, :A].set(params["bah"])
    bhd = bhd.at[:, A].set(params["bvh"][0, 0])

    # weights in bf16 (halves weight DMA, bf16-native MXU); biases stay f32.
    return dict(
        w1=params["w1"].astype(jnp.bfloat16), b1=params["b1"],
        wbr=wbr.astype(jnp.bfloat16), bbr=bbr,
        whd=whd.astype(jnp.bfloat16), bhd=bhd,
    )


def _choose_batch_tile(B):
    """Batch tile: big tiles to amortize per-step overhead (v5e/v6e), but keep
    >= 2 parallel grid steps for large batches so v7x's 2 TensorCores both work."""
    B8 = _round_up(B, SUBLANE)
    if B8 <= 128:
        return B8                                   # single tiny tile, grid=(1,)
    return min(256, _round_up((B8 + 1) // 2, SUBLANE))


def policy_forward(x, packed, *, action_n):
    """x: [B, obs_n] f32. Returns (probs [B, action_n], values [B, 1])."""
    B, obs_n = x.shape
    w1, b1 = packed["w1"], packed["b1"]
    wbr, bbr = packed["wbr"], packed["bbr"]
    whd, bhd = packed["whd"], packed["bhd"]
    out_pad = whd.shape[1]

    TB = _choose_batch_tile(B)
    B_pad = _round_up(B, TB)
    if B_pad != B:
        # Padded rows compute softmax(relu(bias)) garbage; they are sliced away
        # below and never read.
        x = jnp.pad(x, ((0, B_pad - B), (0, 0)))

    grid = (B_pad // TB,)
    kernel = functools.partial(policy_kernel, action_n=action_n)

    out = pl.pallas_call(
        kernel,
        out_shape=jax.ShapeDtypeStruct((B_pad, out_pad), jnp.float32),
        grid_spec=pltpu.PrefetchScalarGridSpec(
            num_scalar_prefetch=0,
            grid=grid,
            in_specs=[
                pl.BlockSpec((TB, obs_n), lambda i: (i, 0)),
                # grid-invariant weight/bias blocks (index_map constant):
                pl.BlockSpec(w1.shape, lambda i: (0, 0)),
                pl.BlockSpec(b1.shape, lambda i: (0, 0)),
                pl.BlockSpec(wbr.shape, lambda i: (0, 0)),
                pl.BlockSpec(bbr.shape, lambda i: (0, 0)),
                pl.BlockSpec(whd.shape, lambda i: (0, 0)),
                pl.BlockSpec(bhd.shape, lambda i: (0, 0)),
            ],
            out_specs=pl.BlockSpec((TB, out_pad), lambda i: (i, 0)),
        ),
        compiler_params=pltpu.CompilerParams(
            dimension_semantics=("parallel",)),
    )(x, w1, b1, wbr, bbr, whd, bhd)

    probs = out[:B, :action_n]
    values = out[:B, action_n:action_n + 1]
    return probs, values


def init_policy_params(key, obs_n, action_n):
    """Deterministic synthetic init mirroring Policy.__init__ / init_weights."""

    def linear(key, in_dim, out_dim, w_range):
        kw, kb = jax.random.split(key)
        # init_weights(): weight.uniform_(-0.1, 0.1); bias keeps PyTorch default
        # Linear init uniform(-1/sqrt(in), 1/sqrt(in)).
        w = jax.random.uniform(kw, (in_dim, out_dim), jnp.float32, -w_range, w_range)
        bound = 1.0 / math.sqrt(in_dim)
        b = jax.random.uniform(kb, (1, out_dim), jnp.float32, -bound, bound)
        return w, b

    k1, k2, k3, k4, k5 = jax.random.split(key, 5)
    w1, b1 = linear(k1, obs_n, 256, 0.1)        # affine1
    wa1, ba1 = linear(k2, 256, 128, 0.1)        # action1
    wv1, bv1 = linear(k3, 256, 128, 0.1)        # value1
    wah, bah = linear(k4, 128, action_n, 0.1)   # action_head
    # value_head keeps PyTorch default init for both weight and bias
    wvh, bvh = linear(k5, 128, 1, 1.0 / math.sqrt(128))
    return dict(
        w1=w1, b1=b1, wa1=wa1, ba1=ba1, wv1=wv1, bv1=bv1,
        wah=wah, bah=bah, wvh=wvh, bvh=bvh,
    )


if __name__ == "__main__":
    obs_n, action_n, batch = 16, 8, 4

    key = jax.random.PRNGKey(0)
    k_params, k_x = jax.random.split(key)
    params = init_policy_params(k_params, obs_n, action_n)
    packed = pack_policy_params(params)
    x = jax.random.normal(k_x, (batch, obs_n), jnp.float32)

    fwd = jax.jit(policy_forward, static_argnames=("action_n",))
    probs, values = fwd(x, packed, action_n=action_n)
    jax.block_until_ready((probs, values))

    # --- pure-JAX reference using the same bf16 weight/activation pipeline ---
    def mm(a, w):
        return jnp.dot(a.astype(jnp.bfloat16), w.astype(jnp.bfloat16),
                       preferred_element_type=jnp.float32)

    h_ref = jnp.maximum(mm(x, params["w1"]) + params["b1"], 0.0)
    xa_ref = jnp.maximum(mm(h_ref, params["wa1"]) + params["ba1"], 0.0)
    xv_ref = jnp.maximum(mm(h_ref, params["wv1"]) + params["bv1"], 0.0)
    ref_probs = jax.nn.softmax(mm(xa_ref, params["wah"]) + params["bah"], axis=-1)
    ref_values = mm(xv_ref, params["wvh"]) + params["bvh"]

    assert probs.shape == (batch, action_n)
    assert values.shape == (batch, 1)
    assert jnp.allclose(probs, ref_probs, atol=3e-3), "probs mismatch vs reference"
    assert jnp.allclose(values, ref_values, atol=3e-3), "values mismatch vs reference"
    assert jnp.allclose(jnp.sum(probs, axis=-1), 1.0, atol=1e-3), "probs not normalized"

    print("KERNEL_OK")
</pallas_src>

<mosaic_0001>
module attributes {stable_mosaic.version = 11 : i64} {
  func.func @policy_kernel(%arg0: i32, %arg1: memref<8x16xf32, #tpu.memory_space<vmem>>, %arg2: memref<16x256xbf16, #tpu.memory_space<vmem>>, %arg3: memref<1x256xf32, #tpu.memory_space<vmem>>, %arg4: memref<256x256xbf16, #tpu.memory_space<vmem>>, %arg5: memref<1x256xf32, #tpu.memory_space<vmem>>, %arg6: memref<256x128xbf16, #tpu.memory_space<vmem>>, %arg7: memref<1x128xf32, #tpu.memory_space<vmem>>, %arg8: memref<8x128xf32, #tpu.memory_space<vmem>>) attributes {dimension_semantics = [#tpu.dimension_semantics<parallel>], iteration_bounds = array<i64: 1>, scalar_prefetch = 0 : i64, scratch_operands = 0 : i64, tpu.core_type = #tpu.core_type<tc>, window_params = [{transform_indices = @transform_0, window_bounds = array<i64: 8, 16>}, {pipeline_mode = #tpu.pipeline_mode<synchronous>, transform_indices = @transform_1, window_bounds = array<i64: 16, 256>}, {pipeline_mode = #tpu.pipeline_mode<synchronous>, transform_indices = @transform_2, window_bounds = array<i64: 1, 256>}, {pipeline_mode = #tpu.pipeline_mode<synchronous>, transform_indices = @transform_3, window_bounds = array<i64: 256, 256>}, {pipeline_mode = #tpu.pipeline_mode<synchronous>, transform_indices = @transform_4, window_bounds = array<i64: 1, 256>}, {pipeline_mode = #tpu.pipeline_mode<synchronous>, transform_indices = @transform_5, window_bounds = array<i64: 256, 128>}, {pipeline_mode = #tpu.pipeline_mode<synchronous>, transform_indices = @transform_6, window_bounds = array<i64: 1, 128>}, {transform_indices = @transform_7, window_bounds = array<i64: 8, 128>}]} {
    %c0 = arith.constant 0 : index
    %c0_0 = arith.constant 0 : index
    %0 = vector.load %arg1[%c0, %c0_0] : memref<8x16xf32, #tpu.memory_space<vmem>>, vector<8x16xf32>
    %1 = arith.truncf %0 : vector<8x16xf32> to vector<8x16xbf16>
    %c0_1 = arith.constant 0 : index
    %c0_2 = arith.constant 0 : index
    %2 = vector.load %arg2[%c0_1, %c0_2] : memref<16x256xbf16, #tpu.memory_space<vmem>>, vector<16x256xbf16>
    %cst = arith.constant dense<0.000000e+00> : vector<8x256xf32>
    %3 = tpu.matmul %1, %2, %cst {dimension_numbers = #tpu.dot_dimension_numbers<[1], [0], [0], [1], [0, 0, 1, 1], [], []>} : vector<8x16xbf16>, vector<16x256xbf16>, vector<8x256xf32> -> vector<8x256xf32>
    %c0_3 = arith.constant 0 : index
    %c0_4 = arith.constant 0 : index
    %4 = vector.load %arg3[%c0_3, %c0_4] : memref<1x256xf32, #tpu.memory_space<vmem>>, vector<1x256xf32>
    %5 = vector.broadcast %4 : vector<1x256xf32> to vector<8x256xf32>
    %6 = arith.addf %3, %5 : vector<8x256xf32>
    %cst_5 = arith.constant 0.000000e+00 : f32
    %7 = vector.broadcast %cst_5 : f32 to vector<8x256xf32>
    %8 = arith.maximumf %6, %7 : vector<8x256xf32>
    %9 = arith.truncf %8 : vector<8x256xf32> to vector<8x256xbf16>
    %c0_6 = arith.constant 0 : index
    %c0_7 = arith.constant 0 : index
    %10 = vector.load %arg4[%c0_6, %c0_7] : memref<256x256xbf16, #tpu.memory_space<vmem>>, vector<256x256xbf16>
    %cst_8 = arith.constant dense<0.000000e+00> : vector<8x256xf32>
    %11 = tpu.matmul %9, %10, %cst_8 {dimension_numbers = #tpu.dot_dimension_numbers<[1], [0], [0], [1], [0, 0, 1, 1], [], []>} : vector<8x256xbf16>, vector<256x256xbf16>, vector<8x256xf32> -> vector<8x256xf32>
    %c0_9 = arith.constant 0 : index
    %c0_10 = arith.constant 0 : index
    %12 = vector.load %arg5[%c0_9, %c0_10] : memref<1x256xf32, #tpu.memory_space<vmem>>, vector<1x256xf32>
    %13 = vector.broadcast %12 : vector<1x256xf32> to vector<8x256xf32>
    %14 = arith.addf %11, %13 : vector<8x256xf32>
    %cst_11 = arith.constant 0.000000e+00 : f32
    %15 = vector.broadcast %cst_11 : f32 to vector<8x256xf32>
    %16 = arith.maximumf %14, %15 : vector<8x256xf32>
    %17 = arith.truncf %16 : vector<8x256xf32> to vector<8x256xbf16>
    %c0_12 = arith.constant 0 : index
    %c0_13 = arith.constant 0 : index
    %18 = vector.load %arg6[%c0_12, %c0_13] : memref<256x128xbf16, #tpu.memory_space<vmem>>, vector<256x128xbf16>
    %cst_14 = arith.constant dense<0.000000e+00> : vector<8x128xf32>
    %19 = tpu.matmul %17, %18, %cst_14 {dimension_numbers = #tpu.dot_dimension_numbers<[1], [0], [0], [1], [0, 0, 1, 1], [], []>} : vector<8x256xbf16>, vector<256x128xbf16>, vector<8x128xf32> -> vector<8x128xf32>
    %c0_15 = arith.constant 0 : index
    %c0_16 = arith.constant 0 : index
    %20 = vector.load %arg7[%c0_15, %c0_16] : memref<1x128xf32, #tpu.memory_space<vmem>>, vector<1x128xf32>
    %21 = vector.broadcast %20 : vector<1x128xf32> to vector<8x128xf32>
    %22 = arith.addf %19, %21 : vector<8x128xf32>
    %23 = tpu.iota {dimensions = array<i32: 1>} : vector<8x128xi32>
    %c8_i32 = arith.constant 8 : i32
    %24 = vector.broadcast %c8_i32 : i32 to vector<8x128xi32>
    %25 = arith.cmpi slt, %23, %24 : vector<8x128xi32>
    %cst_17 = arith.constant 0xFF800000 : f32
    %26 = vector.broadcast %cst_17 : f32 to vector<8x128xf32>
    %27 = arith.select %25, %22, %26 : vector<8x128xi1>, vector<8x128xf32>
    %cst_18 = arith.constant dense<0xFF800000> : vector<8xf32>
    %28 = vector.multi_reduction <maximumf>, %27, %cst_18 [1] : vector<8x128xf32> to vector<8xf32>
    %29 = vector.shape_cast %28 : vector<8xf32> to vector<8x1xf32>
    %30 = vector.broadcast %29 : vector<8x1xf32> to vector<8x128xf32>
    %31 = arith.subf %27, %30 : vector<8x128xf32>
    %32 = math.exp %31 : vector<8x128xf32>
    %cst_19 = arith.constant dense<0.000000e+00> : vector<8xf32>
    %33 = vector.multi_reduction <add>, %32, %cst_19 [1] : vector<8x128xf32> to vector<8xf32>
    %34 = vector.shape_cast %33 : vector<8xf32> to vector<8x1xf32>
    %35 = vector.broadcast %34 : vector<8x1xf32> to vector<8x128xf32>
    %36 = arith.divf %32, %35 : vector<8x128xf32>
    %c8_i32_20 = arith.constant 8 : i32
    %37 = vector.broadcast %c8_i32_20 : i32 to vector<8x128xi32>
    %38 = arith.cmpi eq, %23, %37 : vector<8x128xi32>
    %cst_21 = arith.constant 0.000000e+00 : f32
    %39 = vector.broadcast %cst_21 : f32 to vector<8x128xf32>
    %40 = arith.select %38, %22, %39 : vector<8x128xi1>, vector<8x128xf32>
    %41 = arith.select %25, %36, %40 : vector<8x128xi1>, vector<8x128xf32>
    %c0_22 = arith.constant 0 : index
    %c0_23 = arith.constant 0 : index
    %42 = vector.load %arg8[%c0_22, %c0_23] : memref<8x128xf32, #tpu.memory_space<vmem>>, vector<8x128xf32>
    tpu.vector_store %arg8[%c0_22, %c0_23], %41 {strides = array<i32>} : memref<8x128xf32, #tpu.memory_space<vmem>>, vector<8x128xf32>,
    return
  }
  func.func @transform_0(%arg0: i32) -> (i32, i32) {
    %c0_i32 = arith.constant 0 : i32
    %c0_i32_0 = arith.constant 0 : i32
    return %arg0, %c0_i32 : i32, i32
  }
  func.func @transform_1(%arg0: i32) -> (i32, i32) {
    %c0_i32 = arith.constant 0 : i32
    %c0_i32_0 = arith.constant 0 : i32
    %c0_i32_1 = arith.constant 0 : i32
    return %c0_i32, %c0_i32_0 : i32, i32
  }
  func.func @transform_2(%arg0: i32) -> (i32, i32) {
    %c0_i32 = arith.constant 0 : i32
    %c0_i32_0 = arith.constant 0 : i32
    %c0_i32_1 = arith.constant 0 : i32
    return %c0_i32, %c0_i32_0 : i32, i32
  }
  func.func @transform_3(%arg0: i32) -> (i32, i32) {
    %c0_i32 = arith.constant 0 : i32
    %c0_i32_0 = arith.constant 0 : i32
    %c0_i32_1 = arith.constant 0 : i32
    return %c0_i32, %c0_i32_0 : i32, i32
  }
  func.func @transform_4(%arg0: i32) -> (i32, i32) {
    %c0_i32 = arith.constant 0 : i32
    %c0_i32_0 = arith.constant 0 : i32
    %c0_i32_1 = arith.constant 0 : i32
    return %c0_i32, %c0_i32_0 : i32, i32
  }
  func.func @transform_5(%arg0: i32) -> (i32, i32) {
    %c0_i32 = arith.constant 0 : i32
    %c0_i32_0 = arith.constant 0 : i32
    %c0_i32_1 = arith.constant 0 : i32
    return %c0_i32, %c0_i32_0 : i32, i32
  }
  func.func @transform_6(%arg0: i32) -> (i32, i32) {
    %c0_i32 = arith.constant 0 : i32
    %c0_i32_0 = arith.constant 0 : i32
    %c0_i32_1 = arith.constant 0 : i32
    return %c0_i32, %c0_i32_0 : i32, i32
  }
  func.func @transform_7(%arg0: i32) -> (i32, i32) {
    %c0_i32 = arith.constant 0 : i32
    %c0_i32_0 = arith.constant 0 : i32
    return %arg0, %c0_i32 : i32, i32
  }
}

</mosaic_0001>

<bundles_post_ra>
// kernel: policy_forward.1
= control target key start
LH: loop header
LB: loop body
LE: loop exit
PB: predicated region body
PF: predicated region fallthrough
CT: control target
= control target key end

     0   :  { %12 = vsyncpa [#allocation3], 0  ;;  %s882_s0 = inlined_call_operand.vmem [shape: f32[8,16], index: 0, kind: input, shape index: {}]   ;;  %s883_s1 = inlined_call_operand.vmem [shape: bf16[16,256], index: 1, kind: input, shape index: {}]   ;;  %s884_s2 = inlined_call_operand.vmem [shape: f32[1,256], index: 2, kind: input, shape index: {}]   ;;  %s885_s3 = inlined_call_operand.hbm [shape: bf16[256,256], index: 3, kind: input, shape index: {}]   ;;  %s886_s4 = inlined_call_operand.vmem [shape: f32[1,256], index: 4, kind: input, shape index: {}]   ;;  %s887_s5 = inlined_call_operand.hbm [shape: bf16[256,128], index: 5, kind: input, shape index: {}]   ;;  %s888_s6 = inlined_call_operand.hbm [shape: f32[1,128], index: 6, kind: input, shape index: {}]   ;;  %s889_s7 = inlined_call_operand.vmem [shape: f32[8,128], index: 7, kind: output, shape index: {}]  }
   0x1   :  { %13 = vsyncpa [#allocation5], 0  ;;  %s805_s24 = smov [#allocation4]  }
   0x2   :  { %s39_s25 = sshll.u32 %s805_s24, 4  ;;  %s40_s25 = int_to_ptr.vmem [resolvable:$true] %s39_s25 }
   0x3   :  { %s749_s26 = scalar_lea.vmem %s40_s25, 2048  ;;  %p754_p1 = scmp.lt.s32.totalorder %s40_s25, %s40_s25 }
   0x4   :  { %p750_p0 = scmp.ne.s32.totalorder %s40_s25, %s749_s26  ;;  %p755_p2 = scmp.lt.s32.totalorder %s749_s26, %s749_s26 }
   0x6   :  { %p756_p3 = por %p755_p2, %p754_p1 }
   0x8   :  { %p757_p4 = pnand %p756_p3, %p750_p0 }
   0xa   :  { %760 = shalt.err (!%p757_p4)
}
   0xb   :  { %s806_s27 = smov 64   ;;  %s807_s28 = smov 4  }
   0xc   :  { %45 = dma.hbm_to_vmem [thread:$0]  %s887_s5, 2048, %s40_s25, [#allocation5], %s806_s27, %s806_s27, %s807_s28  }
   0xd   :  { %s808_s8 = smov [#allocation2]  }
   0xe   :  { %s25_s9 = sshll.u32 %s808_s8, 4  ;;  %s26_s9 = int_to_ptr.vmem [resolvable:$true] %s25_s9 }
   0xf   :  { %s769_s10 = scalar_lea.vmem %s26_s9, 4096  ;;  %p774_p6 = scmp.lt.s32.totalorder %s26_s9, %s26_s9 }
  0x10   :  { %p770_p5 = scmp.ne.s32.totalorder %s26_s9, %s769_s10  ;;  %p775_p7 = scmp.lt.s32.totalorder %s769_s10, %s769_s10 }
  0x12   :  { %p776_p8 = por %p775_p7, %p774_p6 }
  0x14   :  { %p777_p9 = pnand %p776_p8, %p770_p5 }
  0x16   :  { %780 = shalt.err (!%p777_p9)
}
  0x17   :  { %s809_s11 = smov 128   ;;  %s810_s12 = smov 8  }
  0x18   :  { %31 = dma.hbm_to_vmem [thread:$0]  %s885_s3, 4096, %s26_s9, [#allocation3], %s809_s11, %s809_s11, %s810_s12  }
  0x19   :  { %s811_s15 = smov [#allocation6]  }
  0x1a   :  { %s52_s16 = sshll.u32 %s811_s15, 4  ;;  %s53_s16 = int_to_ptr.vmem [resolvable:$true] %s52_s16 }
  0x1b   :  { %s789_s5 = scalar_lea.vmem %s53_s16, 16  ;;  %s793_s17 = scalar_lea.vmem %s53_s16, 32 }
  0x1c   :  { %p790_p10 = scmp.ne.s32.totalorder %s53_s16, %s789_s5  ;;  %p794_p11 = scmp.lt.s32.totalorder %s53_s16, %s53_s16 }
  0x1d   :  { %p795_p12 = scmp.lt.s32.totalorder %s793_s17, %s789_s5 }
  0x1f   :  { %p796_p13 = por %p795_p12, %p794_p11 }
  0x21   :  { %p797_p0 = pnand %p796_p13, %p790_p10 }
  0x23   :  { %800 = shalt.err (!%p797_p0)
}
  0x24   :  { %55 = dma.hbm_to_vmem [thread:$0]  %s888_s6, 16, %s53_s16, [#allocation5]  }
  0x25   :  { %801 = dma.done.wait [#allocation3], 4096  }
  0x26   :  { %802 = vsyncadd [#allocation3], 4294963200 }
  0x27   :  { %803 = dma.done.wait [#allocation5], 2064  }
  0x28   :  { %804 = vsyncadd [#allocation5], 4294965232  ;;  %v812_v0 = vmov 0   ;;  %v670_v1 = vld [vmem:[%s883_s1 + $0x4] ss:$8 sps:$4 sm:$0xff]   ;;  %vm92_vm0 = vcmask 130048   ;;  %v72_v49 = vlaneseq }
  0x29   :  { %128 = vmatprep.mubr.bf16.mxu0 %v812_v0  ;;  %v672_v2 = vld [vmem:[%s883_s1] ss:$8 sps:$4 sm:$0xff]   ;;  %110 = vmatprep.subr.bf16.mxu0 %v670_v1  ;;  %v673_v5 = vld [vmem:[#allocation2 + $0x74] ss:$8 sps:$4 sm:$0xff]   ;;  %v675_v6 = vld [vmem:[#allocation2 + $0x70] ss:$8 sps:$4 sm:$0xff]  }
  0x2a   :  { %v66_v3 = vld [vmem:[%s882_s0] sm:$0xff]  ;;  %111 = vmatpush1.bf16.msra.mxu0 %v672_v2  ;;  %345 = vmatprep.subr.bf16.mxu1 %v673_v5  ;;  %v679_v9 = vld [vmem:[#allocation2 + $0x54] ss:$8 sps:$4 sm:$0xff]   ;;  %v681_v10 = vld [vmem:[#allocation2 + $0x50] ss:$8 sps:$4 sm:$0xff]   ;;  %v73_v50 = vshrl.u32 %v72_v49, 7 }
  0x2b   :  { %v67_v4 = vpack.c.bf16 %v66_v3, %v66_v3  ;;  %v676_v7 = vld [vmem:[#allocation2 + $0x64] ss:$8 sps:$4 sm:$0xff]   ;;  %346 = vmatpush1.bf16.msra.mxu1 %v675_v6  ;;  %v678_v8 = vld [vmem:[#allocation2 + $0x60] ss:$8 sps:$4 sm:$0xff]   ;;  %v685_v13 = vld [vmem:[#allocation2 + $0x34] ss:$8 sps:$4 sm:$0xff]  }
  0x2c   :  { %347 = vmatprep.subr.bf16.mxu1 %v676_v7  ;;  %v682_v11 = vld [vmem:[#allocation2 + $0x44] ss:$8 sps:$4 sm:$0xff]   ;;  %v684_v12 = vld [vmem:[#allocation2 + $0x40] ss:$8 sps:$4 sm:$0xff]   ;;  %v687_v14 = vld [vmem:[#allocation2 + $0x30] ss:$8 sps:$4 sm:$0xff]  }
  0x2d   :  { %590 = vmatmul.mubr.msk.bf16.vlgmr.msra.gmra.mxu0 %vm92_vm0, %v67_v4  ;;  %v688_v15 = vld [vmem:[#allocation2 + $0x24] ss:$8 sps:$4 sm:$0xff]   ;;  %v690_v16 = vld [vmem:[#allocation2 + $0x20] ss:$8 sps:$4 sm:$0xff]   ;;  %v691_v17 = vld [vmem:[#allocation2 + $0x14] ss:$8 sps:$4 sm:$0xff]  }
  0x2e   :  { %v693_v18 = vld [vmem:[#allocation2 + $0x10] ss:$8 sps:$4 sm:$0xff]   ;;  %v694_v19 = vld [vmem:[#allocation2 + $0x4] ss:$8 sps:$4 sm:$0xff]   ;;  %v696_v20 = vld [vmem:[#allocation2] ss:$8 sps:$4 sm:$0xff]  }
  0x2f   :  { %348 = vmatpush1.bf16.msra.mxu1 %v678_v8  ;;  %v697_v21 = vld [vmem:[#allocation2 + $0xf4] ss:$8 sps:$4 sm:$0xff]   ;;  %v699_v22 = vld [vmem:[#allocation2 + $0xf0] ss:$8 sps:$4 sm:$0xff]   ;;  %v700_v23 = vld [vmem:[#allocation2 + $0xe4] ss:$8 sps:$4 sm:$0xff]  }
  0x30   :  { %349 = vmatprep.subr.bf16.mxu1 %v679_v9  ;;  %v702_v24 = vld [vmem:[#allocation2 + $0xe0] ss:$8 sps:$4 sm:$0xff]   ;;  %v703_v25 = vld [vmem:[#allocation2 + $0xd4] ss:$8 sps:$4 sm:$0xff]   ;;  %v705_v26 = vld [vmem:[#allocation2 + $0xd0] ss:$8 sps:$4 sm:$0xff]  }
  0x31   :  { %v706_v27 = vld [vmem:[#allocation2 + $0xc4] ss:$8 sps:$4 sm:$0xff]   ;;  %v708_v28 = vld [vmem:[#allocation2 + $0xc0] ss:$8 sps:$4 sm:$0xff]   ;;  %v709_v29 = vld [vmem:[#allocation2 + $0xb4] ss:$8 sps:$4 sm:$0xff]  }
  0x32   :  { %v711_v30 = vld [vmem:[#allocation2 + $0xb0] ss:$8 sps:$4 sm:$0xff]   ;;  %v712_v31 = vld [vmem:[#allocation2 + $0xa4] ss:$8 sps:$4 sm:$0xff]   ;;  %v714_v32 = vld [vmem:[#allocation2 + $0xa0] ss:$8 sps:$4 sm:$0xff]  }
  0x33   :  { %350 = vmatpush1.bf16.msra.mxu1 %v681_v10  ;;  %v715_v33 = vld [vmem:[#allocation2 + $0x94] ss:$8 sps:$4 sm:$0xff]   ;;  %v717_v34 = vld [vmem:[#allocation2 + $0x90] ss:$8 sps:$4 sm:$0xff]   ;;  %v718_v35 = vld [vmem:[#allocation2 + $0x84] ss:$8 sps:$4 sm:$0xff]  }
  0x34   :  { %351 = vmatprep.subr.bf16.mxu1 %v682_v11  ;;  %v720_v36 = vld [vmem:[#allocation2 + $0x80] ss:$8 sps:$4 sm:$0xff]   ;;  %v721_v37 = vld [vmem:[#allocation4 + $0x78] sm:$0xff]   ;;  %v723_v39 = vld [vmem:[#allocation4 + $0x70] sm:$0xff]   ;;  %v74_v51 = vsub.s32 0, %v73_v50  ;;  %v78_v53 = vsub.s32 1, %v73_v50 }
  0x35   :  { %v722_v38 = vld [vmem:[#allocation4 + $0x38] sm:$0xff]   ;;  %640 = vmatprep.subr.bf16.mxu0 %v721_v37  ;;  %v724_v40 = vld [vmem:[#allocation4 + $0x30] sm:$0xff]   ;;  %v725_v41 = vld [vmem:[#allocation4 + $0x68] sm:$0xff]  }
  0x36   :  { %641 = vmatpush3.bf16.msra.mxu0 %v722_v38  ;;  %v726_v42 = vld [vmem:[#allocation4 + $0x28] sm:$0xff]   ;;  %v727_v43 = vld [vmem:[#allocation4 + $0x60] sm:$0xff]   ;;  %v729_v45 = vld [vmem:[#allocation4 + $0x58] sm:$0xff]  }
  0x37   :  { %352 = vmatpush1.bf16.msra.mxu1 %v684_v12  ;;  %642 = vmatprep.subr.bf16.mxu0 %v723_v39  ;;  %v728_v44 = vld [vmem:[#allocation4 + $0x20] sm:$0xff]   ;;  %v730_v46 = vld [vmem:[#allocation4 + $0x18] sm:$0xff]   ;;  %v731_v47 = vld [vmem:[#allocation4 + $0x50] sm:$0xff]  }
  0x38   :  { %353 = vmatprep.subr.bf16.mxu1 %v685_v13  ;;  %v732_v48 = vld [vmem:[#allocation4 + $0x10] sm:$0xff]   ;;  %v70_v52 = vld [vmem:[%s884_s2] sm:$0x3]  ;;  %v733_v2 = vld [vmem:[#allocation4 + $0x48] sm:$0xff]  }
  0x39   :  { %v75_v54 = vrot.slane %v70_v52, %v74_v51  ;;  %v79_v55 = vrot.slane %v70_v52, %v78_v53  ;;  %v734_v3 = vld [vmem:[#allocation4 + $0x8] sm:$0xff]   ;;  %v735_v4 = vld [vmem:[#allocation4 + $0x40] sm:$0xff]  }
  0x3a   :  { %643 = vmatpush3.bf16.msra.mxu0 %v724_v40  ;;  %v736_v5 = vld [vmem:[#allocation4] sm:$0xff]  }
  0x3b   :  { %354 = vmatpush1.bf16.msra.mxu1 %v687_v14  ;;  %644 = vmatprep.subr.bf16.mxu0 %v725_v41  ;;  %v173_v6 = vld [vmem:[%s886_s4] sm:$0x3] }
  0x3c   :  { %355 = vmatprep.subr.bf16.mxu1 %v688_v15  ;;  %v178_v7 = vrot.slane %v173_v6, %v74_v51  ;;  %v182_v8 = vrot.slane %v173_v6, %v78_v53 }
  0x3e   :  { %645 = vmatpush3.bf16.msra.mxu0 %v726_v42 }
  0x3f   :  { %356 = vmatpush1.bf16.msra.mxu1 %v690_v16  ;;  %646 = vmatprep.subr.bf16.mxu0 %v727_v43 }
  0x40   :  { %357 = vmatprep.subr.bf16.mxu1 %v691_v17 }
  0x42   :  { %647 = vmatpush3.bf16.msra.mxu0 %v728_v44 }
  0x43   :  { %358 = vmatpush1.bf16.msra.mxu1 %v693_v18  ;;  %648 = vmatprep.subr.bf16.mxu0 %v729_v45 }
  0x44   :  { %359 = vmatprep.subr.bf16.mxu1 %v694_v19 }
  0x46   :  { %649 = vmatpush3.bf16.msra.mxu0 %v730_v46 }
  0x47   :  { %360 = vmatpush1.bf16.msra.mxu1 %v696_v20  ;;  %650 = vmatprep.subr.bf16.mxu0 %v731_v47  ;;  %v566_v20 = vand.u32 127, %v72_v49 }
  0x48   :  { %361 = vmatprep.subr.bf16.mxu1 %v697_v21 }
  0x49   :  { %vm567_vm1 = vcmp.lt.s32.totalorder %v566_v20, 8  ;;  %vm578_vm2 = vcmp.eq.s32.totalorder %v566_v20, 8 }
  0x4a   :  { %651 = vmatpush3.bf16.msra.mxu0 %v732_v48 }
  0x4b   :  { %362 = vmatpush2.bf16.msra.mxu1 %v699_v22  ;;  %652 = vmatprep.subr.bf16.mxu0 %v733_v2  ;;  %v623_v22 = vld [vmem:[#allocation6] ss:$0 sm:$0xff] }
  0x4c   :  { %363 = vmatprep.subr.bf16.mxu1 %v700_v23 }
  0x4e   :  { %653 = vmatpush3.bf16.msra.mxu0 %v734_v3 }
  0x4f   :  { %364 = vmatpush2.bf16.msra.mxu1 %v702_v24  ;;  %654 = vmatprep.subr.bf16.mxu0 %v735_v4 }
  0x50   :  { %365 = vmatprep.subr.bf16.mxu1 %v703_v25 }
  0x52   :  { %655 = vmatpush3.bf16.msra.mxu0 %v736_v5 }
  0x53   :  { %366 = vmatpush2.bf16.msra.mxu1 %v705_v26 }
  0x54   :  { %367 = vmatprep.subr.bf16.mxu1 %v706_v27 }
  0x57   :  { %368 = vmatpush2.bf16.msra.mxu1 %v708_v28 }
  0x58   :  { %369 = vmatprep.subr.bf16.mxu1 %v709_v29 }
  0x5b   :  { %370 = vmatpush2.bf16.msra.mxu1 %v711_v30 }
  0x5c   :  { %371 = vmatprep.subr.bf16.mxu1 %v712_v31 }
  0x5f   :  { %372 = vmatpush2.bf16.msra.mxu1 %v714_v32 }
  0x60   :  { %373 = vmatprep.subr.bf16.mxu1 %v715_v33 }
  0x63   :  { %374 = vmatpush2.bf16.msra.mxu1 %v717_v34 }
  0x64   :  { %375 = vmatprep.subr.bf16.mxu1 %v718_v35 }
  0x67   :  { %376 = vmatpush2.bf16.msra.mxu1 %v720_v36 }
  0xed   :  { %v130_v56 = vpop.f32.mrf.mxu0 }
  0xee   :  { %v131_v57 = vadd.f32 %v130_v56, %v75_v54 }
  0xef   :  { %v132_v58 = vpop.f32.mrf.mxu0 }
  0xf0   :  { %v133_v59 = vadd.f32 %v132_v58, %v79_v55  ;;  %v137_v60 = vmax.f32 %v131_v57, 0.0 }
  0xf1   :  { %v134_v61 = vpop.f32.mrf.mxu0 }
  0xf2   :  { %v138_v62 = vmax.f32 %v133_v59, 0.0  ;;  %v139_v1 = vpack.c.bf16 %v137_v60, %v137_v60 }
  0xf3   :  { %v135_v63 = vpop.f32.mrf.mxu0 }
  0xf4   :  { %v140_v0 = vpack.c.bf16 %v138_v62, %v138_v62 }
  0xf6   :  { %377 = vmatprep.mubr.bf16.mxu1 %v140_v0 }
  0xf7   :  { %378 = vmatmul.mubr.bf16.vlgmr.msra.gmra.mxu1 %v139_v1 }
 0x1b7   :  { %v379_v9 = vpop.f32.mrf.mxu1 }
 0x1b8   :  { %v380_v10 = vadd.f32 %v379_v9, %v178_v7 }
 0x1b9   :  { %v381_v11 = vpop.f32.mrf.mxu1 }
 0x1ba   :  { %v382_v12 = vadd.f32 %v381_v11, %v182_v8  ;;  %v386_v13 = vmax.f32 %v380_v10, 0.0 }
 0x1bb   :  { %v383_v14 = vpop.f32.mrf.mxu1 }
 0x1bc   :  { %v387_v15 = vmax.f32 %v382_v12, 0.0  ;;  %v388_v18 = vpack.c.bf16 %v386_v13, %v386_v13 }
 0x1bd   :  { %v384_v16 = vpop.f32.mrf.mxu1 }
 0x1be   :  { %v389_v17 = vpack.c.bf16 %v387_v15, %v387_v15 }
 0x1c0   :  { %557 = vmatprep.mubr.bf16.mxu0 %v389_v17 }
 0x1c1   :  { %558 = vmatmul.mubr.bf16.vlgmr.msra.gmra.mxu0 %v388_v18 }
 0x281   :  { %v656_v19 = vpop.f32.mrf.mxu0 }
 0x283   :  { %v657_v21 = vpop.f32.mrf.mxu0 }
 0x284   :  { %v658_v23 = vadd.f32 %v657_v21, %v656_v19 }
 0x285   :  { %v659_v24 = vpop.f32.mrf.mxu0 }
 0x286   :  { %v560_v25 = vadd.f32 %v658_v23, %v623_v22 }
 0x287   :  { %v660_v26 = vpop.f32.mrf.mxu0 }
 0x288   :  { %v568_v27 = vsel %vm567_vm1, %v560_v25, -inf  ;;  %v579_v28 = vsel %vm578_vm2, %v560_v25, 0.0 }
 0x289   :  { %569 = vmax.xlane.f32.xlu0 %v568_v27 }
 0x312   :  { %v570_v29 = vpop.xlane.xlu0 %569 }
 0x313   :  { %v571_v30 = vsub.f32 %v568_v27, %v570_v29 }
 0x315   :  { %v572_v31 = vmul.f32 1.442695, %v571_v30 }
 0x317   :  { %737 = vpow2.f32 %v572_v31 }
 0x324   :  { %v738_v32 = vpop.eup %737 }
 0x325   :  { %574 = vadd.xlane.f32.xlu0 %v738_v32 }
 0x3ae   :  { %v575_v33 = vpop.xlane.xlu0 %574 }
 0x3af   :  { %739 = vrcp.f32 %v575_v33 }
 0x3bc   :  { %v740_v34 = vpop.eup %739 }
 0x3bd   :  { %v577_v35 = vmul.f32 %v740_v34, %v738_v32 }
 0x3bf   :  { %v580_v36 = vsel %vm567_vm1, %v577_v35, %v579_v28 }
 0x3c0   :  { %581 = vst [vmem:[%s889_s7] sm:$0xff] %v580_v36 }
 0x3c1   :  { %586 = vsyncpa [#allocation3], 1 }
 0x3c2   :  { %587 = vsyncpa [#allocation5], 1 }

</bundles_post_ra>
